<compile_context>
chip_gen: v7x
topology: tpu7x:2x2x1
jax: 0.10.0
libtpu: 0.0.40
codegen_flags: <defaults>
</compile_context>

<pallas_src>
import functools

import jax
import jax.numpy as jnp
from jax import lax
from jax.experimental import pallas as pl
from jax.experimental.pallas import tpu as pltpu


def _ae_loss_kernel(logits_ref, y_ref, out_ref, acc_ref, *,
                    gamma: float, batch: int, block_b: int, n_inner: int):
    o = pl.program_id(0)          # "parallel" axis (megacore split of the batch)
    i = pl.program_id(1)          # "arbitrary" reduction axis over batch blocks

    @pl.when(i == 0)
    def _init():
        acc_ref[...] = jnp.zeros_like(acc_ref)

    logits = logits_ref[...].astype(jnp.float32)              # (TB, C)
    y = y_ref[...]                                            # (TB, 1) int32
    tb, c = logits.shape

    # ---- logits_loss partial: fused one-hot gather, per-row reduce only ----
    col_ids = lax.broadcasted_iota(jnp.int32, (tb, c), 1)     # (TB, C)
    picked = jnp.where(col_ids == y, logits, 0.0)             # (TB, C)
    row_gather = jnp.sum(picked, axis=1, keepdims=True)       # (TB, 1)

    # ---- consistency partial: det = sumsq / (sqrt(sumsq) + eps)^2 ----------
    sumsq = jnp.sum(logits * logits, axis=1, keepdims=True)   # (TB, 1)
    eps = jnp.finfo(jnp.float32).eps
    denom = jnp.sqrt(sumsq) + eps                             # (TB, 1)
    det = sumsq / (denom * denom)                             # (TB, 1)

    # Row-validity mask (ragged last block / duplicated excess block) applied
    # only on the narrow (TB, 1) column, never on the wide (TB, C) path.
    row0 = (o * n_inner + i) * block_b
    row_ids = row0 + lax.broadcasted_iota(jnp.int32, (tb, 1), 0)
    valid = row_ids < batch                                   # (TB, 1) bool
    det = jnp.where(valid, det, 1.0)                          # log(1) = 0
    row_gather = jnp.where(valid, row_gather, 0.0)

    # Single fused per-row accumulator: sum_b (gamma*log(det_b) - logits[b,y_b]).
    acc_ref[...] += gamma * jnp.log(det) - row_gather

    @pl.when(i == pl.num_programs(1) - 1)
    def _finalize():
        partial = jnp.sum(acc_ref[...])                       # one cross-sublane reduce
        out_ref[...] = jnp.full(out_ref.shape, partial, jnp.float32)


def ae_loss(logits: jax.Array, y: jax.Array, gamma: float,
            *, block_b: int | None = None) -> jax.Array:
    """Pallas implementation of AELoss.forward.

    logits: (B, C) (or (B, ...) — flattened to (B, -1) like the PyTorch view).
    y:      (B,) integer class indices.
    """
    assert gamma >= 0.0, "Regularization strength must be non-negative"
    B = logits.shape[0]
    logits2d = logits.reshape(B, -1)                  # keep original dtype in HBM
    C = logits2d.shape[1]
    y2d = y.reshape(B, 1).astype(jnp.int32)
    itemsize = logits2d.dtype.itemsize

    # Batch tile: multiple of 8 sublanes. Working-set budget per grid step:
    # 2 double-buffered input blocks + ~4 f32-wide in-kernel temporaries
    # (cast / iota / select / square), kept under the 48 MiB VMEM limit so it
    # fits v7x (64 MiB physical) as well as v5e/v6e (128 MiB).
    if block_b is None:
        budget = 36 * 1024 * 1024
        per_row = max(C * (2 * itemsize + 16), 1)
        block_b = max(8, ((budget // per_row) // 8) * 8)
    block_b = max(8, (block_b // 8) * 8)
    block_b = min(block_b, pl.cdiv(B, 8) * 8)

    num_blocks = pl.cdiv(B, block_b)
    n_outer = 2 if num_blocks >= 2 else 1       # shard batch across v7x's 2 TCs
    n_inner = pl.cdiv(num_blocks, n_outer)

    def row_block(o, i):
        # Clamp so that any "excess" trailing block (n_outer*n_inner > num_blocks)
        # re-reads the last real block; its rows are fully masked in-kernel.
        return (jnp.minimum(o * n_inner + i, num_blocks - 1), 0)

    kernel = functools.partial(_ae_loss_kernel, gamma=float(gamma), batch=B,
                               block_b=block_b, n_inner=n_inner)

    cost = pl.CostEstimate(
        flops=5 * B * C,                  # compare/select/reduce + square/reduce
        transcendentals=2 * B,            # sqrt + log per row
        bytes_accessed=B * C * itemsize + B * 4 + n_outer * 8 * 128 * 4,
    )

    partials = pl.pallas_call(
        kernel,
        out_shape=jax.ShapeDtypeStruct((n_outer * 8, 128), jnp.float32),
        grid_spec=pltpu.PrefetchScalarGridSpec(
            num_scalar_prefetch=0,
            grid=(n_outer, n_inner),
            in_specs=[
                pl.BlockSpec((block_b, C), row_block),   # logits tile
                pl.BlockSpec((block_b, 1), row_block),   # label column
            ],
            out_specs=pl.BlockSpec((8, 128), lambda o, i: (o, 0)),
            scratch_shapes=[pltpu.VMEM((block_b, 1), jnp.float32)],
        ),
        compiler_params=pltpu.CompilerParams(
            dimension_semantics=("parallel", "arbitrary"),
            vmem_limit_bytes=48 * 1024 * 1024,
        ),
        cost_estimate=cost,
    )(logits2d, y2d)

    per_core = partials.reshape(n_outer, 8, 128)[:, 0, 0]
    return jnp.sum(per_core) * (1.0 / B)


def ae_loss_reference(logits, y, gamma):
    # Pure-JAX reference mirroring the PyTorch code.
    B = logits.shape[0]
    gathered = jnp.take_along_axis(logits, y.reshape(-1, 1), axis=1)
    logits_loss = -jnp.mean(gathered)
    flat = logits.reshape(B, -1).astype(jnp.float32)
    norm = jnp.linalg.norm(flat, axis=1, keepdims=True)
    eps = jnp.finfo(norm.dtype).eps
    normed = flat / (norm + eps)
    det = jnp.sum(normed * normed, axis=1)
    return logits_loss + gamma * jnp.mean(jnp.log(det))


if __name__ == "__main__":
    key = jax.random.PRNGKey(0)
    k1, k2, k3, k4 = jax.random.split(key, 4)
    gamma = 0.5

    # Case 1: two-core split + ragged last block (B=12, block_b=8 -> grid (2,1)).
    B, C = 12, 32
    logits = jax.random.normal(k1, (B, C), dtype=jnp.float32)
    y = jax.random.randint(k2, (B,), 0, C, dtype=jnp.int32)
    out = jax.block_until_ready(ae_loss(logits, y, gamma, block_b=8))
    ref = ae_loss_reference(logits, y, gamma)
    assert jnp.allclose(out, ref, atol=1e-5, rtol=1e-5), (out, ref)

    # Case 2: auto block size (single block, ragged rows masked).
    out2 = jax.block_until_ready(ae_loss(logits, y, gamma))
    assert jnp.allclose(out2, ref, atol=1e-5, rtol=1e-5), (out2, ref)

    # Case 3: odd number of blocks -> exercises the clamped "excess" block path
    # (B=20, block_b=8 -> num_blocks=3, grid (2,2)).
    B2, C2 = 20, 32
    logits2 = jax.random.normal(k3, (B2, C2), dtype=jnp.float32)
    y2 = jax.random.randint(k4, (B2,), 0, C2, dtype=jnp.int32)
    out3 = jax.block_until_ready(ae_loss(logits2, y2, gamma, block_b=8))
    ref3 = ae_loss_reference(logits2, y2, gamma)
    assert jnp.allclose(out3, ref3, atol=1e-5, rtol=1e-5), (out3, ref3)

    print("KERNEL_OK")
</pallas_src>

<mosaic_0001>
module attributes {stable_mosaic.version = 11 : i64} {
  func.func @_ae_loss_kernel(%arg0: i32, %arg1: i32, %arg2: memref<8x32xf32, #tpu.memory_space<vmem>>, %arg3: memref<8x1xi32, #tpu.memory_space<vmem>>, %arg4: memref<8x128xf32, #tpu.memory_space<vmem>>, %arg5: memref<8x1xf32, #tpu.memory_space<vmem>>) attributes {dimension_semantics = [#tpu.dimension_semantics<parallel>, #tpu.dimension_semantics<arbitrary>], iteration_bounds = array<i64: 2, 1>, scalar_prefetch = 0 : i64, scratch_operands = 1 : i64, tpu.core_type = #tpu.core_type<tc>, window_params = [{transform_indices = @transform_0, window_bounds = array<i64: 8, 32>}, {transform_indices = @transform_1, window_bounds = array<i64: 8, 1>}, {transform_indices = @transform_2, window_bounds = array<i64: 8, 128>}]} {
    %c0_i32 = arith.constant 0 : i32
    %0 = arith.cmpi eq, %arg1, %c0_i32 : i32
    %1 = arith.extui %0 : i1 to i32
    %c0_i32_0 = arith.constant 0 : i32
    %2 = arith.cmpi ne, %1, %c0_i32_0 : i32
    scf.if %2 {
      %cst_16 = arith.constant 0.000000e+00 : f32
      %42 = vector.broadcast %cst_16 : f32 to vector<8x1xf32>
      %c0_17 = arith.constant 0 : index
      %c0_18 = arith.constant 0 : index
      %43 = vector.load %arg5[%c0_17, %c0_18] : memref<8x1xf32, #tpu.memory_space<vmem>>, vector<8x1xf32>
      tpu.vector_store %arg5[%c0_17, %c0_18], %42 {strides = array<i32>} : memref<8x1xf32, #tpu.memory_space<vmem>>, vector<8x1xf32>,
    } else {
    }
    %c0 = arith.constant 0 : index
    %c0_1 = arith.constant 0 : index
    %3 = vector.load %arg2[%c0, %c0_1] : memref<8x32xf32, #tpu.memory_space<vmem>>, vector<8x32xf32>
    %c0_2 = arith.constant 0 : index
    %c0_3 = arith.constant 0 : index
    %4 = vector.load %arg3[%c0_2, %c0_3] : memref<8x1xi32, #tpu.memory_space<vmem>>, vector<8x1xi32>
    %5 = tpu.iota {dimensions = array<i32: 1>} : vector<8x32xi32>
    %6 = vector.broadcast %4 : vector<8x1xi32> to vector<8x32xi32>
    %7 = arith.cmpi eq, %5, %6 : vector<8x32xi32>
    %cst = arith.constant 0.000000e+00 : f32
    %8 = vector.broadcast %cst : f32 to vector<8x32xf32>
    %9 = arith.select %7, %3, %8 : vector<8x32xi1>, vector<8x32xf32>
    %cst_4 = arith.constant dense<0.000000e+00> : vector<8xf32>
    %10 = vector.multi_reduction <add>, %9, %cst_4 [1] : vector<8x32xf32> to vector<8xf32>
    %11 = vector.shape_cast %10 : vector<8xf32> to vector<8x1xf32>
    %12 = arith.mulf %3, %3 : vector<8x32xf32>
    %cst_5 = arith.constant dense<0.000000e+00> : vector<8xf32>
    %13 = vector.multi_reduction <add>, %12, %cst_5 [1] : vector<8x32xf32> to vector<8xf32>
    %14 = vector.shape_cast %13 : vector<8xf32> to vector<8x1xf32>
    %15 = math.sqrt %14 : vector<8x1xf32>
    %cst_6 = arith.constant 1.1920929E-7 : f32
    %16 = vector.broadcast %cst_6 : f32 to vector<8x1xf32>
    %17 = arith.addf %15, %16 : vector<8x1xf32>
    %18 = arith.mulf %17, %17 : vector<8x1xf32>
    %19 = arith.divf %14, %18 : vector<8x1xf32>
    %c1_i32 = arith.constant 1 : i32
    %20 = arith.muli %arg0, %c1_i32 : i32
    %21 = arith.addi %20, %arg1 : i32
    %c8_i32 = arith.constant 8 : i32
    %22 = arith.muli %21, %c8_i32 : i32
    %23 = tpu.iota {dimensions = array<i32: 0>} : vector<8x1xi32>
    %24 = vector.broadcast %22 : i32 to vector<8x1xi32>
    %25 = arith.addi %24, %23 : vector<8x1xi32>
    %c12_i32 = arith.constant 12 : i32
    %26 = vector.broadcast %c12_i32 : i32 to vector<8x1xi32>
    %27 = arith.cmpi slt, %25, %26 : vector<8x1xi32>
    %cst_7 = arith.constant 1.000000e+00 : f32
    %28 = vector.broadcast %cst_7 : f32 to vector<8x1xf32>
    %29 = arith.select %27, %19, %28 : vector<8x1xi1>, vector<8x1xf32>
    %cst_8 = arith.constant 0.000000e+00 : f32
    %30 = vector.broadcast %cst_8 : f32 to vector<8x1xf32>
    %31 = arith.select %27, %11, %30 : vector<8x1xi1>, vector<8x1xf32>
    %c0_9 = arith.constant 0 : index
    %c0_10 = arith.constant 0 : index
    %32 = vector.load %arg5[%c0_9, %c0_10] : memref<8x1xf32, #tpu.memory_space<vmem>>, vector<8x1xf32>
    %33 = math.log %29 : vector<8x1xf32>
    %cst_11 = arith.constant 5.000000e-01 : f32
    %34 = vector.broadcast %cst_11 : f32 to vector<8x1xf32>
    %35 = arith.mulf %34, %33 : vector<8x1xf32>
    %36 = arith.subf %35, %31 : vector<8x1xf32>
    %37 = arith.addf %32, %36 : vector<8x1xf32>
    %c0_12 = arith.constant 0 : index
    %c0_13 = arith.constant 0 : index
    %38 = vector.load %arg5[%c0_12, %c0_13] : memref<8x1xf32, #tpu.memory_space<vmem>>, vector<8x1xf32>
    tpu.vector_store %arg5[%c0_12, %c0_13], %37 {strides = array<i32>} : memref<8x1xf32, #tpu.memory_space<vmem>>, vector<8x1xf32>,
    %c0_i32_14 = arith.constant 0 : i32
    %39 = arith.cmpi eq, %arg1, %c0_i32_14 : i32
    %40 = arith.extui %39 : i1 to i32
    %c0_i32_15 = arith.constant 0 : i32
    %41 = arith.cmpi ne, %40, %c0_i32_15 : i32
    scf.if %41 {
      %c0_16 = arith.constant 0 : index
      %c0_17 = arith.constant 0 : index
      %42 = vector.load %arg5[%c0_16, %c0_17] : memref<8x1xf32, #tpu.memory_space<vmem>>, vector<8x1xf32>
      %43 = vector.shape_cast %42 : vector<8x1xf32> to vector<1x8x1xf32>
      %cst_18 = arith.constant dense<0.000000e+00> : vector<1xf32>
      %44 = vector.multi_reduction <add>, %43, %cst_18 [1, 2] : vector<1x8x1xf32> to vector<1xf32>
      %45 = vector.shape_cast %44 : vector<1xf32> to vector<1x1x1xf32>
      %46 = vector.extract %45[0, 0, 0] : f32 from vector<1x1x1xf32>
      %47 = vector.broadcast %46 : f32 to vector<8x128xf32>
      %c0_19 = arith.constant 0 : index
      %c0_20 = arith.constant 0 : index
      %48 = vector.load %arg4[%c0_19, %c0_20] : memref<8x128xf32, #tpu.memory_space<vmem>>, vector<8x128xf32>
      tpu.vector_store %arg4[%c0_19, %c0_20], %47 {strides = array<i32>} : memref<8x128xf32, #tpu.memory_space<vmem>>, vector<8x128xf32>,
    } else {
    }
    return
  }
  func.func @transform_0(%arg0: i32, %arg1: i32) -> (i32, i32) {
    %c1_i32 = arith.constant 1 : i32
    %0 = arith.muli %arg0, %c1_i32 : i32
    %1 = arith.addi %0, %arg1 : i32
    %c1_i32_0 = arith.constant 1 : i32
    %2 = arith.minsi %1, %c1_i32_0 : i32
    %c0_i32 = arith.constant 0 : i32
    %c0_i32_1 = arith.constant 0 : i32
    return %2, %c0_i32 : i32, i32
  }
  func.func @transform_1(%arg0: i32, %arg1: i32) -> (i32, i32) {
    %c1_i32 = arith.constant 1 : i32
    %0 = arith.muli %arg0, %c1_i32 : i32
    %1 = arith.addi %0, %arg1 : i32
    %c1_i32_0 = arith.constant 1 : i32
    %2 = arith.minsi %1, %c1_i32_0 : i32
    %c0_i32 = arith.constant 0 : i32
    %c0_i32_1 = arith.constant 0 : i32
    return %2, %c0_i32 : i32, i32
  }
  func.func @transform_2(%arg0: i32, %arg1: i32) -> (i32, i32) {
    %c0_i32 = arith.constant 0 : i32
    %c0_i32_0 = arith.constant 0 : i32
    return %arg0, %c0_i32 : i32, i32
  }
}

</mosaic_0001>

<bundles_post_ra>
// kernel: tpu_custom_call.1
= control target key start
LH: loop header
LB: loop body
LE: loop exit
PB: predicated region body
PF: predicated region fallthrough
CT: control target
= control target key end

     0   :  { %7 = vsyncpa [#allocation4], 0  ;;  %s672_s0 = inlined_call_operand.vmem [shape: f32[12,32], index: 0, kind: input, shape index: {}]   ;;  %s673_s1 = inlined_call_operand.vmem [shape: s32[12,1], index: 1, kind: input, shape index: {}]   ;;  %s674_s2 = inlined_call_operand.hbm [shape: f32[16,128], index: 2, kind: output, shape index: {}]  }
   0x1   :  { %9 = vsyncpa [#allocation4 + $0x1], 0  ;;  %s553_s9 = smov 0   ;;  %s555_s10 = smov 0  }
   0x2   :  { %s557_s11 = smov 0   ;;  %s559_s12 = smov 0  }
   0x3   :  { %s561_s13 = smov 0   ;;  %s563_s14 = smov 0  }
   0x4 LB: > { %s370_s15 = sadd.s32 4294967295, %s533_s14   ;;  %s371_s16 = sadd.s32 4294967294, %s533_s14   ;;  %s533_s14 = sphi %s563_s14, %s15_s14   ;;  %s529_s13 = sphi %s561_s13, %s681_s13   ;;  %s525_s12 = sphi %s559_s12, %s680_s12   ;;  %s521_s11 = sphi %s557_s11, %s679_s11   ;;  %s517_s10 = sphi %s555_s10, %s678_s10   ;;  %s513_s9 = sphi %s553_s9, %s677_s9  }
   0x5   : > { %s27_s17 = sadd.s32 1, %s529_s13  ;;  %s98_s18 = sadd.s32 1, %s521_s11 }
   0x6   : > { %p29_p0 = scmp.ge.s32.totalorder %s27_s17, 2  ;;  %p108_p1 = scmp.ne.s32.totalorder %s521_s11, %s517_s10 }
   0x7   : > { %p109_p2 = scmp.eq.s32.totalorder %s370_s15, 1  ;;  %p114_p3 = scmp.ne.s32.totalorder %s517_s10, %s513_s9 }
   0x8   : > { %s683_s17 = smov (%p29_p0, %s27_s17), 0  ;;  %p115_p5 = scmp.eq.s32.totalorder %s371_s16, 1 }
   0x9   : > { %p593_p4 = por %p109_p2, %p108_p1  ;;  %s95_s20 = ssub.s32 %s529_s13, %s683_s17 }
   0xa   : > { %p374_p6 = scmp.ge.s32.totalorder %s533_s14, 1  ;;  %p96_p7 = scmp.eq.s32.totalorder %s95_s20, 0 }
   0xb   : > { %p600_p8 = por %p115_p5, %p114_p3  ;;  %p159_p9 = scmp.lt.s32.totalorder %s533_s14, 3 }
   0xc   : > { %s606_s22 = scalar_select %p96_p7, %s521_s11, %s98_s18  }
   0xd   : > { %p160_p10 = pnand %p374_p6, %p159_p9 }
   0xe   : > { %p191_p11 = scmp.lt.s32.totalorder (!%p160_p10), %s525_s12, 1  ;;  %v535_v0 = vmov (!%p160_p10), 0   ;;  %vm225_vm0 = vcmask (!%p160_p10), 261120   ;;  %v218_v5 = vlaneseq (!%p160_p10)  ;;  %vm214_vm2 = vcmask (!%p160_p10), 7168   ;;  %s384_s3 = sshll.u32 (!%p160_p10), %s525_s12, 3 }
   0xf   : > { %163 = sbr.rel (%p160_p10) target bundleno = 534 (0x216), region = 28  ;;  %448 = vset.pattern.permute.xlu0 (!%p160_p10), %v535_v0  ;;  %v536_v10 = vmov (!%p160_p10), 0.0   ;;  %v248_v20 = vstv (!%p160_p10), %s384_s3  ;;  %s187_s4 = sand.u32 (!%p160_p10), 1, %s517_s10  }
  0x10   : > { %v219_v6 = vand.u32 (!%p160_p10), 127, %v218_v5  ;;  %215 = vst.msk [vmem:[#allocation2] sm:$0xff] (!%p160_p10), %vm214_vm2, %v536_v10  ;;  %v247_v19 = vshrl.u32 (!%p160_p10), %v218_v5, 7  ;;  %s375_s5 = sshll.u32 (!%p160_p10), %s187_s4, 3  ;;  %s386_s8 = sshll.u32 (!%p160_p10), %s525_s12, 7 }
  0x11   : > { %s189_s6 = scalar_lea.vmem (!%p160_p10), [#allocation3], %s375_s5  ;;  %s627_s20 = scalar_lea.hbm (!%p160_p10), %s674_s2, %s386_s8 }
  0x12   : > { %v249_v22 = vadd.s32 (!%p160_p10), %v248_v20, %v247_v19  ;;  %s291_s7 = sshll.u32 (!%p160_p10), %s189_s6, 4  ;;  %s622_s7 = int_to_ptr.vmem [resolvable:$true] %s291_s7 }
  0x14   : > { %vm250_vm5 = vcmp.lt.s32.totalorder (!%p160_p10), %v249_v22, 12 }
  0x16   : > { %s192_s23 = scalar_select %p191_p11, %s525_s12, 1 }
  0x17   : > { %v253_v30 = vld [vmem:[#allocation2] sm:$0xff]  ;;  %s537_s12 = smov [#allocation3]  }
  0x18   : > { %s685_s23 = smov (!%p191_p11, %s192_s23), 1  ;;  %s459_s25 = sshll.u32 %s537_s12, 4  ;;  %s460_s25 = int_to_ptr.vmem [resolvable:$false] %s459_s25 }
  0x19   : > { %s379_s24 = sshll.u32 %s685_s23, 3  ;;  %s278_s23 = scalar_lea.sflag [#allocation4], %s187_s4 }
  0x1a   : > { %s206_s27 = scalar_lea.vmem %s673_s1, %s379_s24  ;;  %s196_s30 = scalar_lea.vmem %s672_s0, %s379_s24 }
  0x1b   : > { %v217_v1 = vld [vmem:[%s206_s27] sm:$0xff]  ;;  %s455_s24 = scalar_lea.vmem %s622_s7, 128  ;;  %s461_s26 = scalar_lea.vmem %s460_s25, 256 }
  0x1c   : > { %221 = vperm.xlu0 %448, %v217_v1   ;;  %v216_v2 = vld [vmem:[%s196_s30] sm:$0xff]  ;;  %p456_p12 = scmp.ne.s32.totalorder %s622_s7, %s455_s24  ;;  %p462_p1 = scmp.lt.s32.totalorder %s622_s7, %s460_s25 }
  0x1d   : > { %v229_v3 = vmul.f32 %v216_v2, %v216_v2  ;;  %p463_p2 = scmp.lt.s32.totalorder %s461_s26, %s455_s24 }
  0x1e   : > { %p457_p13 = pnand %p456_p12, %p593_p4 }
  0x1f   : > { %v230_v4 = vsel %vm225_vm0, %v229_v3, 0.0  ;;  %p464_p3 = por %p463_p2, %p462_p1 }
  0x20   : > { %p458_p0 = pneg %p457_p13 }
  0x22   : > { %p465_p5 = pnand %p464_p3, %p458_p0 }
  0x3b   : > { %231 = vadd.xlane.f32.xlu0 %v230_v4 }
  0x9b   : > { %v222_v7 = vpop.permute.xlu0 %221 }
  0x9c   : > { %vm223_vm1 = vcmp.eq.s32.totalorder %v219_v6, %v222_v7 }
  0x9d   : > { %v224_v8 = vsel %vm223_vm1, %v216_v2, 0.0 }
  0x9e   : > { %v226_v9 = vsel %vm225_vm0, %v224_v8, 0.0 }
  0x9f   : > { %227 = vadd.xlane.f32.xlu1 %v226_v9 }
  0xc8   : > { %v232_v11 = vpop.xlane.xlu0 %231 }
  0xc9   : > { %449 = vrsqrt.f32 %v232_v11  ;;  %vm235_vm3 = vcmp.eq.f32.partialorder %v232_v11, inf  ;;  %v238_v14 = vand.u32 2147483648, %v232_v11  ;;  %vm237_vm4 = vcmp.eq.f32.partialorder %v232_v11, 0.0 }
  0xd3   : > { %v450_v12 = vpop.eup %449 }
  0xd4   : > { %v234_v13 = vmul.f32 %v450_v12, %v232_v11 }
  0xd6   : > { %v236_v15 = vsel %vm235_vm3, %v232_v11, %v234_v13 }
  0xd7   : > { %v239_v16 = vsel %vm237_vm4, %v238_v14, %v236_v15 }
  0xd8   : > { %v240_v17 = vadd.f32 1.1920929e-07, %v239_v16 }
  0xda   : > { %v241_v18 = vmul.f32 %v240_v17, %v240_v17 }
  0xdc   : > { %451 = vrcp.f32 %v241_v18 }
  0xe6   : > { %v452_v21 = vpop.eup %451 }
  0xe7   : > { %v243_v23 = vmul.f32 %v452_v21, %v232_v11 }
  0xe9   : > { %v251_v24 = vsel %vm250_vm5, %v243_v23, 1.0 }
  0xea   : > { %453 = vlog2.f32 %v251_v24 }
  0xf4   : > { %v454_v25 = vpop.eup %453 }
  0xf5   : > { %v255_v26 = vmul.f32 0.6931472, %v454_v25 }
  0xf7   : > { %v256_v27 = vmul.f32 0.5, %v255_v26 }
 0x12c   : > { %v228_v28 = vpop.xlane.xlu1 %227 }
 0x12d   : > { %v252_v29 = vsel %vm250_vm5, %v228_v28, 0.0 }
 0x12e   : > { %v257_v31 = vsub.f32 %v256_v27, %v252_v29 }
 0x130   : > { %v258_v32 = vadd.f32 %v257_v31, %v253_v30 }
 0x132   : > { %260 = vst.msk [vmem:[#allocation2] sm:$0xff] %vm214_vm2, %v258_v32 }
 0x139   : > { %v264_v33 = vld [vmem:[#allocation2] sm:$0xff] }
 0x13a   : > { %v265_v34 = vsel %vm214_vm2, %v264_v33, 0.0 }
 0x13b   : > { %266 = vadd.xlane.f32.xlu1 %v265_v34 }
 0x1c8   : > { %v267_v35 = vpop.xlane.xlu1 %266 }
 0x1c9   : > { %v268_v36 = vrot.slane %v267_v35, 4 }
 0x1cb   : > { %v269_v37 = vadd.f32 %v268_v36, %v267_v35 }
 0x1cd   : > { %v270_v38 = vrot.slane %v269_v37, 2 }
 0x1cf   : > { %v271_v39 = vadd.f32 %v270_v38, %v269_v37 }
 0x1d1   : > { %v272_v40 = vrot.slane %v271_v39, 1 }
 0x1d3   : > { %v273_v41 = vadd.f32 %v272_v40, %v271_v39 }
 0x1d5   : > { %389 = vpush %v273_v41 }
 0x206   : > { %s390_s15 = spop %389 }
 0x207   : > { %v275_v42 = vstv %s390_s15 }
 0x208   : > { %276 = vst [vmem:[%s189_s6] sm:$0xff] %v275_v42 }
 0x209   : > { %468 = shalt.err (!%p465_p5)
}
 0x20a   : > { %s469_s27 = scalar_lea.hbm %s627_s20, 128  ;;  %s473_s30 = scalar_lea.hbm %s674_s2, 256 }
 0x20b   : > { %p470_p6 = scmp.ne.s32.totalorder %s627_s20, %s469_s27  ;;  %p474_p10 = scmp.lt.u32.totalorder %s627_s20, %s674_s2 }
 0x20c   : > { %p475_p11 = scmp.lt.u32.totalorder %s473_s30, %s469_s27  ;;  %p477_p13 = scmp.lt.u32.totalorder %s469_s27, %s627_s20 }
 0x20d   : > { %p471_p7 = pnand %p470_p6, %p593_p4 }
 0x20e   : > { %p476_p12 = por %p475_p11, %p474_p10 }
 0x20f   : > { %p472_p9 = pneg %p471_p7 }
 0x210   : > { %p478_p0 = por %p477_p13, %p476_p12 }
 0x212   : > { %p479_p1 = pnand %p478_p0, %p472_p9 }
 0x214   : > { %482 = shalt.err (!%p479_p1)
}
 0x215   : > { %391 = dma.vmem_to_hbm [thread:$0]  (%p593_p4), %s622_s7, 128, %s627_s20, %s278_s23  }
 0x216 PF: > { %p397_p2 = scmp.ge.s32.totalorder %s533_s14, 2  ;;  %s303_s5 = sand.u32 1, %s513_s9  }
 0x217   : > { %s304_s6 = scalar_lea.sflag [#allocation4], %s303_s5 }
 0x218   : > { %p394_p3 = pnand %p397_p2, %p600_p8 }
 0x21a   : > { %508 = dma.done.wait (!%p394_p3), %s304_s6, 128  }
 0x21b   : > { %510 = vsyncadd (!%p394_p3), %s304_s6, 4294967168  ;;  %s15_s14 = sadd.s32 1, %s533_s14   ;;  %s677_s9 = smov %s517_s10 }
 0x21c   : > { %p12_p5 = scmp.ge.s32.totalorder %s15_s14, 4   ;;  %s678_s10 = smov %s521_s11 }
 0x21d   : > { %s679_s11 = smov %s606_s22  ;;  %s680_s12 = smov %s529_s13 }
 0x21e   : > { %s681_s13 = smov %s683_s17  ;;  %14 = sbr.rel (!%p12_p5) target bundleno = 4 (0x4), region = 74 }
 0x225   :  { %309 = vsyncpa [#allocation4], 1 }
 0x226   :  { %311 = vsyncpa [#allocation4 + $0x1], 1 }

</bundles_post_ra>
